<compile_context>
chip_gen: v7x
topology: tpu7x:2x2x1
jax: 0.10.0
libtpu: 0.0.40
codegen_flags: <defaults>
</compile_context>

<pallas_src>
import jax
import jax.numpy as jnp
from jax.experimental import pallas as pl
from jax.experimental.pallas import tpu as pltpu


def mlp_kernel(x_ref, w1_ref, b1_ref, w2_ref, b2_ref, w3_ref, b3_ref, o_ref):
    # x_ref : (TILE_B, D) f32    w1_ref: (D, 32)   b1_ref: (1, 32)
    # w2_ref: (32, 16)           b2_ref: (1, 16)
    # w3_ref: (16, 1)            b3_ref: (1, 1)
    # o_ref : (1, 1, TILE_B) f32
    x = x_ref[...]

    # Layer 1: (TILE_B, D) @ (D, 32) on the MXU, f32 accumulate.
    h1 = jnp.dot(x, w1_ref[...], preferred_element_type=jnp.float32) + b1_ref[...]
    h1 = jnp.maximum(h1, 0.0)

    # Layer 2: (TILE_B, 32) @ (32, 16).
    h2 = jnp.dot(h1, w2_ref[...], preferred_element_type=jnp.float32) + b2_ref[...]
    h2 = jnp.maximum(h2, 0.0)

    # Layer 3 (out_features=1): transpose only the tiny (TILE_B, 16) activation
    # on the XLU and reduce over sublanes -> lane-dense (1, TILE_B) result,
    # instead of an N=1 MXU matmul plus a masked (TILE_B, 1) column store.
    h2t = h2.T                                                  # (16, TILE_B)
    z = jnp.sum(h2t * w3_ref[...], axis=0, keepdims=True) + b3_ref[...]

    o_ref[...] = jax.nn.sigmoid(z).reshape(o_ref.shape)


def _round_up(n, m):
    return ((n + m - 1) // m) * m


def _choose_tile_b(B, D):
    """Batch tile: ~12 MiB per-step working set (double-buffered x tile + f32
    activations), multiple of 128 lanes, >= 2 grid steps for large batches
    (v7x megacore), preferring a divisor of B so x never needs a padded copy."""
    f32 = 4
    target = 12 << 20                                   # per-step working-set target
    per_row = (2 * D + 32 + 16 + 16 + 2) * f32          # x (x2 buffers) + h1 + h2 + h2t + z
    tile = max(128, (target // per_row) // 128 * 128)

    if B <= 256:
        return B if B <= tile else tile                 # small batch: 1-2 tiles

    # Large batch: at least two grid steps so v7x can shard across both TCs.
    tile = min(tile, _round_up(pl.cdiv(B, 2), 128))
    # Prefer a tile (multiple of 128, within 2x of target) dividing B: no pad copy.
    for cand in range(tile, max(tile // 2 - 1, 127), -128):
        if B % cand == 0:
            return cand
    return tile                                         # last tile gets padded


def _vmem_limit_bytes(tile_b, D):
    f32 = 4
    x_buf = 2 * tile_b * D * f32                                  # double-buffered x tile
    out_buf = 2 * tile_b * f32                                    # double-buffered output
    weights = 2 * f32 * (D * 32 + 32 + 32 * 16 + 16 + 16 + 1)     # resident params (x2)
    interm = tile_b * (32 + 16 + 16 + 2) * f32                    # h1, h2, h2t, z
    need = x_buf + out_buf + weights + interm
    return max(32 << 20, min(int(need * 1.3) + (1 << 20), 96 << 20))


def net_forward(x, params):
    """x: (B, D) float32; params in PyTorch nn.Linear layout (see init_params).
    Returns sigmoid(MLP(x)) of shape (B, 1), float32."""
    B, D = x.shape

    tile_b = _choose_tile_b(B, D)
    grid_b = pl.cdiv(B, tile_b)
    b_pad = grid_b * tile_b
    # Only copy x when the last tile is ragged (tile choice prefers divisors of B).
    x_in = x if b_pad == B else jnp.pad(x, ((0, b_pad - B), (0, 0)))

    w1t = params["w1"].T.astype(jnp.float32)              # (D, 32)
    b1 = params["b1"].reshape(1, 32).astype(jnp.float32)
    w2t = params["w2"].T.astype(jnp.float32)              # (32, 16)
    b2 = params["b2"].reshape(1, 16).astype(jnp.float32)
    w3c = params["w3"].T.astype(jnp.float32)              # (16, 1) column for sublane reduce
    b3 = params["b3"].reshape(1, 1).astype(jnp.float32)

    const = lambda shape: pl.BlockSpec(shape, lambda i: (0,) * len(shape))

    cost = pl.CostEstimate(
        flops=2 * B * (32 * D + 32 * 16 + 16) + 5 * B * 66,
        transcendentals=B,
        bytes_accessed=4 * (B * D + B + D * 32 + 32 + 32 * 16 + 16 + 16 + 1),
    )

    out = pl.pallas_call(
        mlp_kernel,
        out_shape=jax.ShapeDtypeStruct((grid_b, 1, tile_b), jnp.float32),
        grid=(grid_b,),
        in_specs=[
            pl.BlockSpec((tile_b, D), lambda i: (i, 0)),   # x: contiguous (tile_b, D) DMA
            const((D, 32)), const((1, 32)),                # weights/biases VMEM-resident
            const((32, 16)), const((1, 16)),
            const((16, 1)), const((1, 1)),
        ],
        out_specs=pl.BlockSpec((1, 1, tile_b), lambda i: (i, 0, 0)),
        compiler_params=pltpu.CompilerParams(
            dimension_semantics=("parallel",),             # v7x: shard batch over both TCs
            vmem_limit_bytes=_vmem_limit_bytes(tile_b, D),
        ),
        cost_estimate=cost,
    )(x_in, w1t, b1, w2t, b2, w3c, b3)

    # (G, 1, TILE_B) lane-dense slab -> (B, 1); padded rows (if any) are at the end.
    return out.reshape(-1)[:B].reshape(B, 1)


def init_params(key, input_dim):
    """PyTorch nn.Linear layout: weight (out_features, in_features), bias (out_features,),
    both U(-1/sqrt(fan_in), 1/sqrt(fan_in))."""
    def linear(k, fan_in, fan_out):
        kw, kb = jax.random.split(k)
        bound = 1.0 / jnp.sqrt(fan_in)
        w = jax.random.uniform(kw, (fan_out, fan_in), jnp.float32, -bound, bound)
        b = jax.random.uniform(kb, (fan_out,), jnp.float32, -bound, bound)
        return w, b

    k1, k2, k3 = jax.random.split(key, 3)
    w1, b1 = linear(k1, input_dim, 32)
    w2, b2 = linear(k2, 32, 16)
    w3, b3 = linear(k3, 16, 1)
    return {"w1": w1, "b1": b1, "w2": w2, "b2": b2, "w3": w3, "b3": b3}


def reference_forward(x, p):
    """Pure-JAX f32 reference mirroring the PyTorch module."""
    h1 = jnp.maximum(x @ p["w1"].T + p["b1"], 0.0)
    h2 = jnp.maximum(h1 @ p["w2"].T + p["b2"], 0.0)
    return jax.nn.sigmoid(h2 @ p["w3"].T + p["b3"])


if __name__ == "__main__":
    key = jax.random.PRNGKey(0)
    kx, kp = jax.random.split(key)

    batch, input_dim = 8, 8   # small demo shapes consistent with the module
    x = jax.random.normal(kx, (batch, input_dim), jnp.float32)
    params = init_params(kp, input_dim)

    out = jax.block_until_ready(net_forward(x, params))
    ref = reference_forward(x, params)

    assert out.shape == (batch, 1)
    assert jnp.allclose(out, ref, atol=1e-3, rtol=1e-3)

    print("KERNEL_OK")
</pallas_src>

<mosaic_0001>
module attributes {stable_mosaic.version = 11 : i64} {
  func.func @mlp_kernel(%arg0: i32, %arg1: memref<8x8xf32, #tpu.memory_space<vmem>>, %arg2: memref<8x32xf32, #tpu.memory_space<vmem>>, %arg3: memref<1x32xf32, #tpu.memory_space<vmem>>, %arg4: memref<32x16xf32, #tpu.memory_space<vmem>>, %arg5: memref<1x16xf32, #tpu.memory_space<vmem>>, %arg6: memref<16x1xf32, #tpu.memory_space<vmem>>, %arg7: memref<1x1xf32, #tpu.memory_space<vmem>>, %arg8: memref<1x1x8xf32, #tpu.memory_space<vmem>>) attributes {dimension_semantics = [#tpu.dimension_semantics<parallel>], iteration_bounds = array<i64: 1>, scalar_prefetch = 0 : i64, scratch_operands = 0 : i64, tpu.core_type = #tpu.core_type<tc>, window_params = [{transform_indices = @transform_0, window_bounds = array<i64: 8, 8>}, {pipeline_mode = #tpu.pipeline_mode<synchronous>, transform_indices = @transform_1, window_bounds = array<i64: 8, 32>}, {pipeline_mode = #tpu.pipeline_mode<synchronous>, transform_indices = @transform_2, window_bounds = array<i64: 1, 32>}, {pipeline_mode = #tpu.pipeline_mode<synchronous>, transform_indices = @transform_3, window_bounds = array<i64: 32, 16>}, {pipeline_mode = #tpu.pipeline_mode<synchronous>, transform_indices = @transform_4, window_bounds = array<i64: 1, 16>}, {pipeline_mode = #tpu.pipeline_mode<synchronous>, transform_indices = @transform_5, window_bounds = array<i64: 16, 1>}, {pipeline_mode = #tpu.pipeline_mode<synchronous>, transform_indices = @transform_6, window_bounds = array<i64: 1, 1>}, {transform_indices = @transform_7, window_bounds = array<i64: 1, 1, 8>}]} {
    %c0 = arith.constant 0 : index
    %c0_0 = arith.constant 0 : index
    %0 = vector.load %arg1[%c0, %c0_0] : memref<8x8xf32, #tpu.memory_space<vmem>>, vector<8x8xf32>
    %c0_1 = arith.constant 0 : index
    %c0_2 = arith.constant 0 : index
    %1 = vector.load %arg2[%c0_1, %c0_2] : memref<8x32xf32, #tpu.memory_space<vmem>>, vector<8x32xf32>
    %cst = arith.constant dense<0.000000e+00> : vector<8x32xf32>
    %2 = tpu.matmul %0, %1, %cst {dimension_numbers = #tpu.dot_dimension_numbers<[1], [0], [0], [1], [0, 0, 1, 1], [], []>} : vector<8x8xf32>, vector<8x32xf32>, vector<8x32xf32> -> vector<8x32xf32>
    %c0_3 = arith.constant 0 : index
    %c0_4 = arith.constant 0 : index
    %3 = vector.load %arg3[%c0_3, %c0_4] : memref<1x32xf32, #tpu.memory_space<vmem>>, vector<1x32xf32>
    %4 = vector.broadcast %3 : vector<1x32xf32> to vector<8x32xf32>
    %5 = arith.addf %2, %4 : vector<8x32xf32>
    %cst_5 = arith.constant 0.000000e+00 : f32
    %6 = vector.broadcast %cst_5 : f32 to vector<8x32xf32>
    %7 = arith.maximumf %5, %6 : vector<8x32xf32>
    %c0_6 = arith.constant 0 : index
    %c0_7 = arith.constant 0 : index
    %8 = vector.load %arg4[%c0_6, %c0_7] : memref<32x16xf32, #tpu.memory_space<vmem>>, vector<32x16xf32>
    %cst_8 = arith.constant dense<0.000000e+00> : vector<8x16xf32>
    %9 = tpu.matmul %7, %8, %cst_8 {dimension_numbers = #tpu.dot_dimension_numbers<[1], [0], [0], [1], [0, 0, 1, 1], [], []>} : vector<8x32xf32>, vector<32x16xf32>, vector<8x16xf32> -> vector<8x16xf32>
    %c0_9 = arith.constant 0 : index
    %c0_10 = arith.constant 0 : index
    %10 = vector.load %arg5[%c0_9, %c0_10] : memref<1x16xf32, #tpu.memory_space<vmem>>, vector<1x16xf32>
    %11 = vector.broadcast %10 : vector<1x16xf32> to vector<8x16xf32>
    %12 = arith.addf %9, %11 : vector<8x16xf32>
    %cst_11 = arith.constant 0.000000e+00 : f32
    %13 = vector.broadcast %cst_11 : f32 to vector<8x16xf32>
    %14 = arith.maximumf %12, %13 : vector<8x16xf32>
    %15 = tpu.transpose %14, [1, 0] : vector<8x16xf32> -> vector<16x8xf32>
    %c0_12 = arith.constant 0 : index
    %c0_13 = arith.constant 0 : index
    %16 = vector.load %arg6[%c0_12, %c0_13] : memref<16x1xf32, #tpu.memory_space<vmem>>, vector<16x1xf32>
    %17 = vector.broadcast %16 : vector<16x1xf32> to vector<16x8xf32>
    %18 = arith.mulf %15, %17 : vector<16x8xf32>
    %cst_14 = arith.constant dense<0.000000e+00> : vector<8xf32>
    %19 = vector.multi_reduction <add>, %18, %cst_14 [0] : vector<16x8xf32> to vector<8xf32>
    %20 = vector.shape_cast %19 : vector<8xf32> to vector<1x8xf32>
    %c0_15 = arith.constant 0 : index
    %c0_16 = arith.constant 0 : index
    %21 = vector.load %arg7[%c0_15, %c0_16] : memref<1x1xf32, #tpu.memory_space<vmem>>, vector<1x1xf32>
    %22 = vector.broadcast %21 : vector<1x1xf32> to vector<1x8xf32>
    %23 = arith.addf %20, %22 : vector<1x8xf32>
    %24 = arith.negf %23 : vector<1x8xf32>
    %25 = math.exp %24 : vector<1x8xf32>
    %cst_17 = arith.constant 1.000000e+00 : f32
    %26 = vector.broadcast %cst_17 : f32 to vector<1x8xf32>
    %27 = arith.addf %26, %25 : vector<1x8xf32>
    %28 = arith.divf %26, %27 : vector<1x8xf32>
    %29 = vector.shape_cast %28 : vector<1x8xf32> to vector<1x1x8xf32>
    %c0_18 = arith.constant 0 : index
    %c0_19 = arith.constant 0 : index
    %c0_20 = arith.constant 0 : index
    %30 = vector.load %arg8[%c0_18, %c0_19, %c0_20] : memref<1x1x8xf32, #tpu.memory_space<vmem>>, vector<1x1x8xf32>
    tpu.vector_store %arg8[%c0_18, %c0_19, %c0_20], %29 {strides = array<i32>} : memref<1x1x8xf32, #tpu.memory_space<vmem>>, vector<1x1x8xf32>,
    return
  }
  func.func @transform_0(%arg0: i32) -> (i32, i32) {
    %c0_i32 = arith.constant 0 : i32
    %c0_i32_0 = arith.constant 0 : i32
    return %arg0, %c0_i32 : i32, i32
  }
  func.func @transform_1(%arg0: i32) -> (i32, i32) {
    %c0_i32 = arith.constant 0 : i32
    %c0_i32_0 = arith.constant 0 : i32
    %c0_i32_1 = arith.constant 0 : i32
    return %c0_i32, %c0_i32_0 : i32, i32
  }
  func.func @transform_2(%arg0: i32) -> (i32, i32) {
    %c0_i32 = arith.constant 0 : i32
    %c0_i32_0 = arith.constant 0 : i32
    %c0_i32_1 = arith.constant 0 : i32
    return %c0_i32, %c0_i32_0 : i32, i32
  }
  func.func @transform_3(%arg0: i32) -> (i32, i32) {
    %c0_i32 = arith.constant 0 : i32
    %c0_i32_0 = arith.constant 0 : i32
    %c0_i32_1 = arith.constant 0 : i32
    return %c0_i32, %c0_i32_0 : i32, i32
  }
  func.func @transform_4(%arg0: i32) -> (i32, i32) {
    %c0_i32 = arith.constant 0 : i32
    %c0_i32_0 = arith.constant 0 : i32
    %c0_i32_1 = arith.constant 0 : i32
    return %c0_i32, %c0_i32_0 : i32, i32
  }
  func.func @transform_5(%arg0: i32) -> (i32, i32) {
    %c0_i32 = arith.constant 0 : i32
    %c0_i32_0 = arith.constant 0 : i32
    %c0_i32_1 = arith.constant 0 : i32
    return %c0_i32, %c0_i32_0 : i32, i32
  }
  func.func @transform_6(%arg0: i32) -> (i32, i32) {
    %c0_i32 = arith.constant 0 : i32
    %c0_i32_0 = arith.constant 0 : i32
    %c0_i32_1 = arith.constant 0 : i32
    return %c0_i32, %c0_i32_0 : i32, i32
  }
  func.func @transform_7(%arg0: i32) -> (i32, i32, i32) {
    %c0_i32 = arith.constant 0 : i32
    %c0_i32_0 = arith.constant 0 : i32
    %c0_i32_1 = arith.constant 0 : i32
    return %arg0, %c0_i32, %c0_i32_0 : i32, i32, i32
  }
}

</mosaic_0001>

<bundles_post_ra>
// kernel: tpu_custom_call.1
= control target key start
LH: loop header
LB: loop body
LE: loop exit
PB: predicated region body
PF: predicated region fallthrough
CT: control target
= control target key end

     0   :  { %s449_s0 = inlined_call_operand.vmem [shape: f32[8,8], index: 0, kind: input, shape index: {}]   ;;  %s450_s1 = inlined_call_operand.vmem [shape: f32[8,32], index: 1, kind: input, shape index: {}]   ;;  %s451_s2 = inlined_call_operand.vmem [shape: f32[1,32], index: 2, kind: input, shape index: {}]   ;;  %s452_s3 = inlined_call_operand.vmem [shape: f32[32,16], index: 3, kind: input, shape index: {}]   ;;  %s453_s4 = inlined_call_operand.vmem [shape: f32[1,16], index: 4, kind: input, shape index: {}]   ;;  %s454_s5 = inlined_call_operand.vmem [shape: f32[16,1], index: 5, kind: input, shape index: {}]   ;;  %s455_s6 = inlined_call_operand.<no memory space> [shape: f32[1,1], index: 6, kind: input, shape index: {}]   ;;  %s456_s7 = inlined_call_operand.hbm [shape: f32[1,1,8], index: 7, kind: output, shape index: {}]  }
   0x1   :  { %v12_v0 = vstv %s455_s6 }
   0x2   :  { %13 = vst [vmem:[#allocation2] sm:$0x1] %v12_v0 }
   0x3   :  { %v30_v1 = vld [vmem:[%s450_s1] sm:$0xff]  ;;  %vm38_vm0 = vcmask 64512   ;;  %v356_v3 = vmov 0.0   ;;  %vm357_vm1 = vmmov 0   ;;  %v114_v5 = vld [vmem:[%s452_s3 + $0x8] sm:$0xff]  ;;  %v358_v6 = vmov 0.0|0.0  }
   0x4   :  { %v29_v2 = vld [vmem:[%s449_s0] sm:$0xff]  ;;  %299 = vmatprep.subr.mxu0 %v356_v3  ;;  %301 = vmatprep.mubr.msk.f32.mxu0 %vm357_vm1, %v356_v3 }
   0x5   :  { %v113_v4 = vld [vmem:[%s452_s3] sm:$0xff]  ;;  %300 = vmatpush3.msra.mxu0 %v30_v1  ;;  %315 = vmatprep.subr.bf16.mxu1 %v358_v6 }
   0x6   :  { %v316_v7 = vpack.c.bf16 %v114_v5, %v113_v4 }
   0x7   :  { %14 = vsyncpa [#allocation4], 0  ;;  %302 = vmatmul.mubr.msk.f32.vlgmr.msra.gmra.mrb[0].mxu0 %vm38_vm0, %v29_v2  ;;  %312 = vmatprep.mubr.msk.f32.mxu1 %vm357_vm1, %v356_v3  ;;  %v115_v8 = vld [vmem:[%s452_s3 + $0x10] sm:$0xff]  ;;  %v116_v9 = vld [vmem:[%s452_s3 + $0x18] sm:$0xff]  ;;  %v359_v12 = vmov 0   ;;  %vm124_vm2 = vcmask 261120   ;;  %v260_v34 = vlaneseq }
   0x8   :  { %317 = vmatpush3.bf16.msra.mxu1 %v316_v7  ;;  %v319_v10 = vpack.c.bf16 %v116_v9, %v115_v8  ;;  %327 = vset.pattern.permute.xlu1 %v359_v12  ;;  %v287_v13 = vld [vmem:[%s451_s2] ss:$0 sm:$0xff]  ;;  %v232_v19 = vld [vmem:[%s454_s5 + $0x8] sm:$0xff]  ;;  %s360_s2 = smov [#allocation3]   ;;  %vm271_vm3 = vcmask 57344  }
   0x9   :  { %318 = vmatprep.subr.bf16.mxu1 %v358_v6  ;;  %v254_v11 = vld [vmem:[#allocation2] sm:$0x1]  ;;  %326 = vset.pattern.permute.xlu0 %v359_v12  ;;  %v261_v37 = vshrl.u32 %v260_v34, 7 }
   0xa   :  { %257 = vperm.xlu1 %327, %v254_v11   ;;  %v231_v18 = vld [vmem:[%s454_s5] sm:$0xff] }
   0xb   :  { %235 = vperm.xlu0 %326, %v231_v18   ;;  %v289_v20 = vld [vmem:[%s453_s4] ss:$0 sm:$0xff]  ;;  %v262_v40 = vsub.s32 0, %v261_v37  ;;  %s279_s4 = sshll.u32 %s360_s2, 4  ;;  %s280_s4 = int_to_ptr.vmem [resolvable:$true] %s279_s4 }
   0xc   :  { %320 = vmatpush3.bf16.msra.mxu1 %v319_v10  ;;  %s332_s5 = scalar_lea.vmem %s280_s4, 16  ;;  %s336_s19 = scalar_lea.vmem %s280_s4, 32 }
   0xd   :  { %p333_p0 = scmp.ne.s32.totalorder %s280_s4, %s332_s5  ;;  %p337_p1 = scmp.lt.s32.totalorder %s280_s4, %s280_s4 }
   0xe   :  { %p338_p2 = scmp.lt.s32.totalorder %s336_s19, %s332_s5 }
   0xf   :  { %240 = vperm.xlu0 %326, %v232_v19  }
  0x10   :  { %p339_p3 = por %p338_p2, %p337_p1 }
  0x12   :  { %p340_p4 = pnand %p339_p3, %p333_p0 }
  0x89   :  { %v258_v25 = vpop.permute.xlu1 %257 }
  0x8a   :  { %v236_v26 = vpop.permute.xlu0 %235  ;;  %v263_v43 = vrot.slane %v258_v25, %v262_v40 }
  0x8e   :  { %v241_v29 = vpop.permute.xlu0 %240 }
  0xda   :  { %v108_v14 = vpop.f32.mrb[0].mxu0 }
  0xdb   :  { %v109_v15 = vadd.f32 %v287_v13, %v108_v14  ;;  %v303_v16 = vpop.f32.mrb[1].mxu0 }
  0xdd   :  { %v112_v17 = vmax.f32 %v109_v15, 0.0 }
  0xdf   :  { %313 = vmatmul.mubr.msk.f32.vlgmr.msra.gmra.mrb[0].mxu1 %vm124_vm2, %v112_v17 }
 0x1b2   :  { %v194_v21 = vpop.f32.mrb[0].mxu1 }
 0x1b3   :  { %v195_v22 = vadd.f32 %v289_v20, %v194_v21  ;;  %v314_v23 = vpop.f32.mrb[1].mxu1 }
 0x1b5   :  { %v198_v24 = vmax.f32 %v195_v22, 0.0 }
 0x1b7   :  { %199 = vxpose.xlu1.b32.start.end [1/1] (short) (narrow) %v198_v24, 16 }
 0x237   :  { %v215_v27 = vpop.trf.xlu1 }
 0x238   :  { %v243_v28 = vmul.f32 %v236_v26, %v215_v27 }
 0x23a   :  { %v245_v32 = vsel %vm38_vm0, %v243_v28, 0.0 }
 0x23b   :  { %v216_v30 = vpop.trf.xlu1 }
 0x23c   :  { %v244_v31 = vmul.f32 %v241_v29, %v216_v30 }
 0x23e   :  { %v246_v33 = vsel %vm38_vm0, %v244_v31, 0.0 }
 0x23f   :  { %v247_v35 = vadd.f32 %v246_v33, %v245_v32 }
 0x241   :  { %v248_v36 = vrot.slane %v247_v35, 4 }
 0x243   :  { %v249_v38 = vadd.f32 %v248_v36, %v247_v35 }
 0x245   :  { %v250_v39 = vrot.slane %v249_v38, 2 }
 0x247   :  { %v251_v41 = vadd.f32 %v250_v39, %v249_v38 }
 0x249   :  { %v252_v42 = vrot.slane %v251_v41, 1 }
 0x24b   :  { %v253_v44 = vadd.f32 %v252_v42, %v251_v41 }
 0x24d   :  { %v264_v45 = vadd.f32 %v263_v43, %v253_v44 }
 0x24f   :  { %v291_v46 = vmul.f32 -1.442695, %v264_v45 }
 0x251   :  { %328 = vpow2.f32 %v291_v46 }
 0x25b   :  { %v329_v47 = vpop.eup %328 }
 0x25c   :  { %v268_v48 = vadd.f32 1.0, %v329_v47 }
 0x25e   :  { %330 = vrcp.f32 %v268_v48 }
 0x268   :  { %v331_v49 = vpop.eup %330 }
 0x269   :  { %272 = vst.msk [vmem:[#allocation3] sm:$0x1] %vm271_vm3, %v331_v49 }
 0x26a   :  { %343 = shalt.err (!%p340_p4)
}
 0x26b   :  { %s344_s22 = scalar_lea.hbm %s456_s7, 16 }
 0x26c   :  { %p345_p5 = scmp.ne.s32.totalorder %s456_s7, %s344_s22  ;;  %p348_p6 = scmp.lt.u32.totalorder %s344_s22, %s456_s7 }
 0x26e   :  { %p350_p7 = pnand %p348_p6, %p345_p5 }
 0x270   :  { %353 = shalt.err (!%p350_p7)
}
 0x271   :  { %282 = dma.vmem_to_hbm [thread:$0]  %s280_s4, 16, %s456_s7, [#allocation4]  }
 0x272   :  { %354 = dma.done.wait [#allocation4], 16  }
 0x273   :  { %355 = vsyncadd [#allocation4], 4294967280 }
 0x274   :  { %286 = vsyncpa [#allocation4], 1 }

</bundles_post_ra>
